<compile_context>
chip_gen: v7x
topology: tpu7x:2x2x1
jax: 0.10.0
libtpu: 0.0.40
codegen_flags: <defaults>
</compile_context>

<pallas_src>
import jax
import jax.numpy as jnp
from jax.experimental import pallas as pl
from jax.experimental.pallas import tpu as pltpu


def policy_kernel(xt_ref, w1t_ref, b1_ref, w2t_ref, b2_ref, out_ref):
    # Lane-dense layout: batch on lanes (last axis), features on sublanes.
    # fc1: (h, s) @ (s, TB) -> (h, TB), add per-row bias, relu.
    h = jnp.dot(w1t_ref[...], xt_ref[...], preferred_element_type=jnp.float32)
    h = jnp.maximum(h + b1_ref[...], 0.0)

    # fc2: (a, h) @ (h, TB) -> (a, TB)
    logits = jnp.dot(w2t_ref[...], h, preferred_element_type=jnp.float32)
    logits = logits + b2_ref[...]

    # softmax over the action axis (sublane axis) — per-column, numerically
    # stable via max subtraction.  Equivalent to softmax(dim=1) of the (B, a)
    # PyTorch output.
    m = jnp.max(logits, axis=0, keepdims=True)
    e = jnp.exp(logits - m)
    out_ref[...] = e / jnp.sum(e, axis=0, keepdims=True)


def policy_forward(x, w1, b1, w2, b2, *, block_b=1024):
    """x: (B, s_size); w1: (s_size, h_size); b1: (h_size,);
    w2: (h_size, a_size); b2: (a_size,). Returns (B, a_size) probabilities."""
    B, s_size = x.shape
    h_size, a_size = w2.shape

    # One-time transposes to the lane-dense (features, batch) layout.
    w1t = w1.T                       # (h, s)
    w2t = w2.T                       # (a, h)
    b1c = b1.reshape(h_size, 1)      # column bias, broadcast along lanes
    b2c = b2.reshape(a_size, 1)

    # Batch tile on the lane axis.  Small batches use a single full-B block
    # (block dim == full array dim is always legal); large batches use
    # 128-multiple tiles and pad up so the grid divides evenly.
    tb = block_b if B >= block_b else B
    n_blocks = pl.cdiv(B, tb)
    b_pad = n_blocks * tb
    xt = x.T                         # (s, B)
    if b_pad != B:
        xt = jnp.pad(xt, ((0, 0), (0, b_pad - B)))  # zero cols -> finite softmax

    out_t = pl.pallas_call(
        policy_kernel,
        out_shape=jax.ShapeDtypeStruct((a_size, b_pad), jnp.float32),
        grid=(n_blocks,),
        in_specs=[
            pl.BlockSpec((s_size, tb), lambda i: (0, i)),        # stream x tiles
            pl.BlockSpec((h_size, s_size), lambda i: (0, 0)),    # weights resident
            pl.BlockSpec((h_size, 1), lambda i: (0, 0)),
            pl.BlockSpec((a_size, h_size), lambda i: (0, 0)),
            pl.BlockSpec((a_size, 1), lambda i: (0, 0)),
        ],
        out_specs=pl.BlockSpec((a_size, tb), lambda i: (0, i)),
        compiler_params=pltpu.CompilerParams(
            dimension_semantics=("parallel",)),
    )(xt, w1t, b1c, w2t, b2c)

    return out_t[:, :B].T            # back to (B, a_size)


def init_params(key, s_size=4, h_size=16, a_size=2):
    """Deterministic synthetic params with PyTorch Linear shapes, transposed
    once to (in, out) layout for the wrapper."""
    k1, k2, k3, k4 = jax.random.split(key, 4)
    # PyTorch: fc1.weight (h, s), fc1.bias (h,), fc2.weight (a, h), fc2.bias (a,)
    w1_t = jax.random.normal(k1, (h_size, s_size), jnp.float32) * 0.5
    b1 = jax.random.normal(k2, (h_size,), jnp.float32) * 0.1
    w2_t = jax.random.normal(k3, (a_size, h_size), jnp.float32) * 0.5
    b2 = jax.random.normal(k4, (a_size,), jnp.float32) * 0.1
    return (w1_t.T, b1, w2_t.T, b2)   # (s,h), (h,), (h,a), (a,)


if __name__ == "__main__":
    s_size, h_size, a_size = 4, 16, 2

    key = jax.random.PRNGKey(0)
    kx, kp, kx2 = jax.random.split(key, 3)
    w1, b1, w2, b2 = init_params(kp, s_size, h_size, a_size)

    def ref_fn(x):
        return jax.nn.softmax(jnp.maximum(x @ w1 + b1, 0.0) @ w2 + b2, axis=-1)

    # Small batch (single full-B block), matches the PyTorch module's shapes.
    x_small = jax.random.normal(kx, (8, s_size), jnp.float32)
    p_small = policy_forward(x_small, w1, b1, w2, b2)
    jax.block_until_ready(p_small)
    assert p_small.shape == (8, a_size)
    assert jnp.allclose(jnp.sum(p_small, axis=-1), 1.0, atol=1e-5)
    assert jnp.allclose(p_small, ref_fn(x_small), atol=1e-5)

    # Larger batch exercises the batch grid (2 lane-dense tiles of 1024).
    x_big = jax.random.normal(kx2, (2048, s_size), jnp.float32)
    p_big = policy_forward(x_big, w1, b1, w2, b2)
    jax.block_until_ready(p_big)
    assert p_big.shape == (2048, a_size)
    assert jnp.allclose(jnp.sum(p_big, axis=-1), 1.0, atol=1e-5)
    assert jnp.allclose(p_big, ref_fn(x_big), atol=1e-5)

    print("KERNEL_OK")
</pallas_src>

<mosaic_0001>
module attributes {stable_mosaic.version = 11 : i64} {
  func.func @policy_kernel(%arg0: i32, %arg1: memref<4x8xf32, #tpu.memory_space<vmem>>, %arg2: memref<16x4xf32, #tpu.memory_space<vmem>>, %arg3: memref<16x1xf32, #tpu.memory_space<vmem>>, %arg4: memref<2x16xf32, #tpu.memory_space<vmem>>, %arg5: memref<2x1xf32, #tpu.memory_space<vmem>>, %arg6: memref<2x8xf32, #tpu.memory_space<vmem>>) attributes {dimension_semantics = [#tpu.dimension_semantics<parallel>], iteration_bounds = array<i64: 1>, scalar_prefetch = 0 : i64, scratch_operands = 0 : i64, tpu.core_type = #tpu.core_type<tc>, window_params = [{transform_indices = @transform_0, window_bounds = array<i64: 4, 8>}, {pipeline_mode = #tpu.pipeline_mode<synchronous>, transform_indices = @transform_1, window_bounds = array<i64: 16, 4>}, {pipeline_mode = #tpu.pipeline_mode<synchronous>, transform_indices = @transform_2, window_bounds = array<i64: 16, 1>}, {pipeline_mode = #tpu.pipeline_mode<synchronous>, transform_indices = @transform_3, window_bounds = array<i64: 2, 16>}, {pipeline_mode = #tpu.pipeline_mode<synchronous>, transform_indices = @transform_4, window_bounds = array<i64: 2, 1>}, {transform_indices = @transform_5, window_bounds = array<i64: 2, 8>}]} {
    %c0 = arith.constant 0 : index
    %c0_0 = arith.constant 0 : index
    %0 = vector.load %arg2[%c0, %c0_0] : memref<16x4xf32, #tpu.memory_space<vmem>>, vector<16x4xf32>
    %c0_1 = arith.constant 0 : index
    %c0_2 = arith.constant 0 : index
    %1 = vector.load %arg1[%c0_1, %c0_2] : memref<4x8xf32, #tpu.memory_space<vmem>>, vector<4x8xf32>
    %cst = arith.constant dense<0.000000e+00> : vector<16x8xf32>
    %2 = tpu.matmul %0, %1, %cst {dimension_numbers = #tpu.dot_dimension_numbers<[1], [0], [0], [1], [0, 0, 1, 1], [], []>} : vector<16x4xf32>, vector<4x8xf32>, vector<16x8xf32> -> vector<16x8xf32>
    %c0_3 = arith.constant 0 : index
    %c0_4 = arith.constant 0 : index
    %3 = vector.load %arg3[%c0_3, %c0_4] : memref<16x1xf32, #tpu.memory_space<vmem>>, vector<16x1xf32>
    %4 = vector.broadcast %3 : vector<16x1xf32> to vector<16x8xf32>
    %5 = arith.addf %2, %4 : vector<16x8xf32>
    %cst_5 = arith.constant 0.000000e+00 : f32
    %6 = vector.broadcast %cst_5 : f32 to vector<16x8xf32>
    %7 = arith.maximumf %5, %6 : vector<16x8xf32>
    %c0_6 = arith.constant 0 : index
    %c0_7 = arith.constant 0 : index
    %8 = vector.load %arg4[%c0_6, %c0_7] : memref<2x16xf32, #tpu.memory_space<vmem>>, vector<2x16xf32>
    %cst_8 = arith.constant dense<0.000000e+00> : vector<2x8xf32>
    %9 = tpu.matmul %8, %7, %cst_8 {dimension_numbers = #tpu.dot_dimension_numbers<[1], [0], [0], [1], [0, 0, 1, 1], [], []>} : vector<2x16xf32>, vector<16x8xf32>, vector<2x8xf32> -> vector<2x8xf32>
    %c0_9 = arith.constant 0 : index
    %c0_10 = arith.constant 0 : index
    %10 = vector.load %arg5[%c0_9, %c0_10] : memref<2x1xf32, #tpu.memory_space<vmem>>, vector<2x1xf32>
    %11 = vector.broadcast %10 : vector<2x1xf32> to vector<2x8xf32>
    %12 = arith.addf %9, %11 : vector<2x8xf32>
    %cst_11 = arith.constant dense<0xFF800000> : vector<8xf32>
    %13 = vector.multi_reduction <maximumf>, %12, %cst_11 [0] : vector<2x8xf32> to vector<8xf32>
    %14 = vector.shape_cast %13 : vector<8xf32> to vector<1x8xf32>
    %15 = vector.broadcast %14 : vector<1x8xf32> to vector<2x8xf32>
    %16 = arith.subf %12, %15 : vector<2x8xf32>
    %17 = math.exp %16 : vector<2x8xf32>
    %cst_12 = arith.constant dense<0.000000e+00> : vector<8xf32>
    %18 = vector.multi_reduction <add>, %17, %cst_12 [0] : vector<2x8xf32> to vector<8xf32>
    %19 = vector.shape_cast %18 : vector<8xf32> to vector<1x8xf32>
    %20 = vector.broadcast %19 : vector<1x8xf32> to vector<2x8xf32>
    %21 = arith.divf %17, %20 : vector<2x8xf32>
    %c0_13 = arith.constant 0 : index
    %c0_14 = arith.constant 0 : index
    %22 = vector.load %arg6[%c0_13, %c0_14] : memref<2x8xf32, #tpu.memory_space<vmem>>, vector<2x8xf32>
    tpu.vector_store %arg6[%c0_13, %c0_14], %21 {strides = array<i32>} : memref<2x8xf32, #tpu.memory_space<vmem>>, vector<2x8xf32>,
    return
  }
  func.func @transform_0(%arg0: i32) -> (i32, i32) {
    %c0_i32 = arith.constant 0 : i32
    %c0_i32_0 = arith.constant 0 : i32
    return %c0_i32, %arg0 : i32, i32
  }
  func.func @transform_1(%arg0: i32) -> (i32, i32) {
    %c0_i32 = arith.constant 0 : i32
    %c0_i32_0 = arith.constant 0 : i32
    %c0_i32_1 = arith.constant 0 : i32
    return %c0_i32, %c0_i32_0 : i32, i32
  }
  func.func @transform_2(%arg0: i32) -> (i32, i32) {
    %c0_i32 = arith.constant 0 : i32
    %c0_i32_0 = arith.constant 0 : i32
    %c0_i32_1 = arith.constant 0 : i32
    return %c0_i32, %c0_i32_0 : i32, i32
  }
  func.func @transform_3(%arg0: i32) -> (i32, i32) {
    %c0_i32 = arith.constant 0 : i32
    %c0_i32_0 = arith.constant 0 : i32
    %c0_i32_1 = arith.constant 0 : i32
    return %c0_i32, %c0_i32_0 : i32, i32
  }
  func.func @transform_4(%arg0: i32) -> (i32, i32) {
    %c0_i32 = arith.constant 0 : i32
    %c0_i32_0 = arith.constant 0 : i32
    %c0_i32_1 = arith.constant 0 : i32
    return %c0_i32, %c0_i32_0 : i32, i32
  }
  func.func @transform_5(%arg0: i32) -> (i32, i32) {
    %c0_i32 = arith.constant 0 : i32
    %c0_i32_0 = arith.constant 0 : i32
    return %c0_i32, %arg0 : i32, i32
  }
}

</mosaic_0001>

<bundles_post_ra>
// kernel: tpu_custom_call.1
= control target key start
LH: loop header
LB: loop body
LE: loop exit
PB: predicated region body
PF: predicated region fallthrough
CT: control target
= control target key end

     0   :  { %vm43_vm0 = vcmask 1043456   ;;  %vm36_vm1 = vcmask 31744   ;;  %s371_s0 = inlined_call_operand.vmem [shape: f32[4,8], index: 0, kind: input, shape index: {}]   ;;  %s372_s1 = inlined_call_operand.vmem [shape: f32[16,4], index: 1, kind: input, shape index: {}]   ;;  %s373_s2 = inlined_call_operand.vmem [shape: f32[16,1], index: 2, kind: input, shape index: {}]   ;;  %s374_s3 = inlined_call_operand.vmem [shape: f32[2,16], index: 3, kind: input, shape index: {}]   ;;  %s375_s4 = inlined_call_operand.vmem [shape: f32[2,1], index: 4, kind: input, shape index: {}]   ;;  %s376_s5 = inlined_call_operand.hbm [shape: f32[2,8], index: 5, kind: output, shape index: {}]  }
   0x1   :  { %v23_v0 = vld [vmem:[%s371_s0] sm:$0xf]  ;;  %v22_v2 = vld [vmem:[%s372_s1 + $0x8] sm:$0xff] }
   0x2   :  { %v21_v1 = vld [vmem:[%s372_s1] sm:$0xff]  ;;  %250 = vmatprep.subr.msk.mxu0 %vm43_vm0, %v23_v0 }
   0x3   :  { %252 = vmatprep.mubr.msk.f32.mxu0 %vm36_vm1, %v21_v1  ;;  %v24_v3 = vld [vmem:[%s373_s2] sm:$0xff] }
   0x4   :  { %10 = vsyncpa [#allocation3], 0  ;;  %251 = vmatpush3.msk.msra.mxu0 %vm43_vm0, %v23_v0  ;;  %v300_v4 = vmov 0   ;;  %v25_v5 = vld [vmem:[%s373_s2 + $0x8] sm:$0xff]  ;;  %v301_v6 = vmov 0.0|0.0   ;;  %vm302_vm2 = vmmov 0  }
   0x5   :  { %270 = vset.pattern.permute.xlu0 %v300_v4  ;;  %253 = vmatmul.mubr.msk.f32.vlgmr.msra.gmra.mrb[0].mxu0 %vm36_vm1, %v22_v2  ;;  %v303_v7 = vmov 0.0   ;;  %v125_v8 = vld [vmem:[%s375_s4] sm:$0x3]  ;;  %vm131_vm3 = vcmask 130048   ;;  %vm205_vm4 = vcmask 58368  }
   0x6   :  { %28 = vperm.xlu0 %270, %v24_v3   ;;  %271 = vset.pattern.permute.xlu1 %v300_v4  ;;  %v124_v18 = vld [vmem:[%s374_s3] sm:$0x3]  ;;  %s304_s3 = smov [#allocation2]  }
   0x7   :  { %262 = vmatprep.subr.bf16.mxu1 %v301_v6  ;;  %259 = vmatprep.mubr.msk.f32.mxu1 %vm302_vm2, %v303_v7  ;;  %s232_s4 = sshll.u32 %s304_s3, 4  ;;  %s233_s4 = int_to_ptr.vmem [resolvable:$true] %s232_s4 }
   0x8   :  { %128 = vperm.xlu1 %271, %v125_v8   ;;  %s276_s29 = scalar_lea.vmem %s233_s4, 32  ;;  %p281_p1 = scmp.lt.s32.totalorder %s233_s4, %s233_s4 }
   0x9   :  { %p277_p0 = scmp.ne.s32.totalorder %s233_s4, %s276_s29  ;;  %p282_p2 = scmp.lt.s32.totalorder %s276_s29, %s276_s29 }
   0xa   :  { %33 = vperm.xlu0 %270, %v25_v5  }
   0xb   :  { %p283_p3 = por %p282_p2, %p281_p1 }
   0xd   :  { %p284_p4 = pnand %p283_p3, %p277_p0 }
  0x85   :  { %v29_v9 = vpop.permute.xlu0 %28 }
  0x87   :  { %v129_v19 = vpop.permute.xlu1 %128 }
  0x89   :  { %v34_v10 = vpop.permute.xlu0 %33 }
  0xd8   :  { %v254_v11 = vpop.f32.mrb[0].mxu0 }
  0xd9   :  { %v119_v12 = vadd.f32 %v254_v11, %v34_v10  ;;  %v113_v13 = vpop.f32.mrb[1].mxu0 }
  0xda   :  { %v114_v14 = vadd.f32 %v113_v13, %v29_v9 }
  0xdb   :  { %v123_v15 = vmax.f32 %v119_v12, 0.0 }
  0xdc   :  { %v122_v16 = vmax.f32 %v114_v14, 0.0 }
  0xde   :  { %v263_v17 = vpack.c.bf16 %v123_v15, %v122_v16 }
  0xe0   :  { %264 = vmatpush3.bf16.msra.mxu1 %v263_v17 }
  0xe3   :  { %260 = vmatmul.mubr.msk.f32.vlgmr.msra.gmra.mrb[0].mxu1 %vm131_vm3, %v124_v18 }
 0x1b6   :  { %v201_v20 = vpop.f32.mrb[0].mxu1 }
 0x1b7   :  { %v202_v21 = vadd.f32 %v201_v20, %v129_v19  ;;  %v261_v22 = vpop.f32.mrb[1].mxu1 }
 0x1b9   :  { %v206_v23 = vsel %vm205_vm4, %v202_v21, -inf }
 0x1ba   :  { %v207_v24 = vrot.slane %v206_v23, 4 }
 0x1bc   :  { %v208_v25 = vmax.f32 %v206_v23, %v207_v24 }
 0x1be   :  { %v209_v26 = vrot.slane %v208_v25, 2 }
 0x1c0   :  { %v210_v27 = vmax.f32 %v208_v25, %v209_v26 }
 0x1c2   :  { %v211_v28 = vrot.slane %v210_v27, 1 }
 0x1c4   :  { %v212_v29 = vmax.f32 %v210_v27, %v211_v28 }
 0x1c6   :  { %v213_v30 = vsub.f32 %v202_v21, %v212_v29 }
 0x1c8   :  { %v214_v31 = vmul.f32 1.442695, %v213_v30 }
 0x1ca   :  { %272 = vpow2.f32 %v214_v31 }
 0x1d4   :  { %v273_v32 = vpop.eup %272 }
 0x1d5   :  { %v216_v33 = vsel %vm205_vm4, %v273_v32, 0.0 }
 0x1d6   :  { %v217_v34 = vrot.slane %v216_v33, 4 }
 0x1d8   :  { %v218_v35 = vadd.f32 %v217_v34, %v216_v33 }
 0x1da   :  { %v219_v36 = vrot.slane %v218_v35, 2 }
 0x1dc   :  { %v220_v37 = vadd.f32 %v219_v36, %v218_v35 }
 0x1de   :  { %v221_v38 = vrot.slane %v220_v37, 1 }
 0x1e0   :  { %v222_v39 = vadd.f32 %v221_v38, %v220_v37 }
 0x1e2   :  { %274 = vrcp.f32 %v222_v39 }
 0x1ec   :  { %v275_v40 = vpop.eup %274 }
 0x1ed   :  { %v224_v41 = vmul.f32 %v275_v40, %v273_v32 }
 0x1ef   :  { %225 = vst.msk [vmem:[#allocation2] sm:$0x3] %vm205_vm4, %v224_v41 }
 0x1f0   :  { %287 = shalt.err (!%p284_p4)
}
 0x1f1   :  { %s288_s7 = scalar_lea.hbm %s376_s5, 32 }
 0x1f2   :  { %p289_p5 = scmp.ne.s32.totalorder %s376_s5, %s288_s7  ;;  %p292_p6 = scmp.lt.u32.totalorder %s288_s7, %s376_s5 }
 0x1f4   :  { %p294_p7 = pnand %p292_p6, %p289_p5 }
 0x1f6   :  { %297 = shalt.err (!%p294_p7)
}
 0x1f7   :  { %235 = dma.vmem_to_hbm [thread:$0]  %s233_s4, 32, %s376_s5, [#allocation3]  }
 0x1f8   :  { %298 = dma.done.wait [#allocation3], 32  }
 0x1f9   :  { %299 = vsyncadd [#allocation3], 4294967264 }
 0x1fa   :  { %239 = vsyncpa [#allocation3], 1 }

</bundles_post_ra>
